<compile_context>
chip_gen: v7x
topology: tpu7x:2x2x1
jax: 0.10.0
libtpu: 0.0.40
codegen_flags: <defaults>
</compile_context>

<pallas_src>
import functools

import jax
import jax.numpy as jnp
from jax.experimental import pallas as pl
from jax.experimental.pallas import tpu as pltpu

TRIM_H = 28
TRIM_W = 28

_SUBLANE = 8
_LANE = 128
# ~1 MiB of input per grid step (double-buffered -> ~2-3 MiB VMEM total).
_INPUT_BLOCK_BUDGET_BYTES = 1 << 20


def _round_up(x: int, m: int) -> int:
    return ((x + m - 1) // m) * m


def _trim_kernel(x_ref, o_ref, *, out_h, out_w):
    # x_ref: (bc, h_blk, w_blk) input tile (only the needed window, padded to
    #        the (8, 128) grain or the full dims)
    # o_ref: (bc, out_h, out_w) exact output tile
    o_ref[...] = x_ref[:, :out_h, :out_w]


@jax.jit
def trim(x: jax.Array) -> jax.Array:
    """Pallas equivalent of Trim.forward: x[:, :, :28, :28]."""
    n, c, h, w = x.shape
    itemsize = jnp.dtype(x.dtype).itemsize

    # Faithful to Python slicing semantics: :28 clamps to the dim size.
    out_h = min(h, TRIM_H)
    out_w = min(w, TRIM_W)

    # Fold batch and channel into one contiguous plane axis (free reshape).
    nc = n * c
    xf = x.reshape(nc, h, w)

    # Only DMA the window we actually need, padded to the (8, 128) grain
    # (or the full dim when the array is smaller than the grain).
    h_blk = min(h, _round_up(out_h, _SUBLANE))   # e.g. 32 rows (or full h)
    w_blk = min(w, _round_up(out_w, _LANE))      # e.g. 128 cols (or full w)

    # Planes per grid step: fit the ~1 MiB input budget, and keep >= 2 grid
    # steps whenever possible so v7x's two TensorCores both get work.
    per_plane_bytes = h_blk * w_blk * itemsize
    bc = max(1, _INPUT_BLOCK_BUDGET_BYTES // max(per_plane_bytes, 1))
    bc = min(bc, nc)
    if nc >= 2:
        bc = min(bc, -(-nc // 2))   # ceil(nc / 2) -> at least 2 grid steps

    grid = (pl.cdiv(nc, bc),)

    bytes_accessed = (
        nc * h_blk * w_blk * itemsize      # HBM reads (window only)
        + nc * out_h * out_w * itemsize    # HBM writes (exact output)
    )

    yf = pl.pallas_call(
        functools.partial(_trim_kernel, out_h=out_h, out_w=out_w),
        out_shape=jax.ShapeDtypeStruct((nc, out_h, out_w), x.dtype),
        grid_spec=pltpu.PrefetchScalarGridSpec(
            num_scalar_prefetch=0,
            grid=grid,
            in_specs=[
                pl.BlockSpec((bc, h_blk, w_blk), lambda i: (i, 0, 0)),
            ],
            out_specs=pl.BlockSpec((bc, out_h, out_w), lambda i: (i, 0, 0)),
        ),
        compiler_params=pltpu.CompilerParams(
            dimension_semantics=("parallel",),
        ),
        cost_estimate=pl.CostEstimate(
            flops=0, transcendentals=0, bytes_accessed=bytes_accessed),
    )(xf)

    return yf.reshape(n, c, out_h, out_w)


if __name__ == "__main__":
    key = jax.random.PRNGKey(0)

    # Main case: spatial dims > 28 so the trim is meaningful.
    x = jax.random.normal(key, (2, 4, 32, 32), dtype=jnp.float32)
    y = trim(x)
    jax.block_until_ready(y)
    ref = x[:, :, :TRIM_H, :TRIM_W]
    assert y.shape == (2, 4, TRIM_H, TRIM_W)
    assert y.dtype == x.dtype
    assert jnp.array_equal(y, ref)

    # Awkward-channel / wide-image case: exercises cdiv grid padding and the
    # 128-lane input window.
    x2 = jax.random.normal(jax.random.PRNGKey(1), (1, 3, 40, 200),
                           dtype=jnp.float32)
    y2 = trim(x2)
    jax.block_until_ready(y2)
    assert jnp.array_equal(y2, x2[:, :, :TRIM_H, :TRIM_W])

    print("KERNEL_OK")
</pallas_src>

<mosaic_0001>
module attributes {stable_mosaic.version = 11 : i64} {
  func.func @_trim_kernel(%arg0: i32, %arg1: memref<4x32x32xf32, #tpu.memory_space<vmem>>, %arg2: memref<4x28x28xf32, #tpu.memory_space<vmem>>) attributes {dimension_semantics = [#tpu.dimension_semantics<parallel>], iteration_bounds = array<i64: 2>, scalar_prefetch = 0 : i64, scratch_operands = 0 : i64, tpu.core_type = #tpu.core_type<tc>, window_params = [{transform_indices = @transform_0, window_bounds = array<i64: 4, 32, 32>}, {transform_indices = @transform_1, window_bounds = array<i64: 4, 28, 28>}]} {
    %c0 = arith.constant 0 : index
    %c0_0 = arith.constant 0 : index
    %c0_1 = arith.constant 0 : index
    %0 = vector.load %arg1[%c0, %c0_0, %c0_1] : memref<4x32x32xf32, #tpu.memory_space<vmem>>, vector<4x28x28xf32>
    %c0_2 = arith.constant 0 : index
    %c0_3 = arith.constant 0 : index
    %c0_4 = arith.constant 0 : index
    %1 = vector.load %arg2[%c0_2, %c0_3, %c0_4] : memref<4x28x28xf32, #tpu.memory_space<vmem>>, vector<4x28x28xf32>
    tpu.vector_store %arg2[%c0_2, %c0_3, %c0_4], %0 {strides = array<i32>} : memref<4x28x28xf32, #tpu.memory_space<vmem>>, vector<4x28x28xf32>,
    return
  }
  func.func @transform_0(%arg0: i32) -> (i32, i32, i32) {
    %c0_i32 = arith.constant 0 : i32
    %c0_i32_0 = arith.constant 0 : i32
    %c0_i32_1 = arith.constant 0 : i32
    return %arg0, %c0_i32, %c0_i32_0 : i32, i32, i32
  }
  func.func @transform_1(%arg0: i32) -> (i32, i32, i32) {
    %c0_i32 = arith.constant 0 : i32
    %c0_i32_0 = arith.constant 0 : i32
    %c0_i32_1 = arith.constant 0 : i32
    return %arg0, %c0_i32, %c0_i32_0 : i32, i32, i32
  }
}

</mosaic_0001>

<bundles_post_ra>
// kernel: trim.1
= control target key start
LH: loop header
LB: loop body
LE: loop exit
PB: predicated region body
PF: predicated region fallthrough
CT: control target
= control target key end

     0   :  { %6 = vsyncpa [#allocation3], 0  ;;  %s542_s0 = inlined_call_operand.hbm [shape: f32[8,32,32], index: 0, kind: input, shape index: {}]   ;;  %s543_s1 = inlined_call_operand.vmem [shape: f32[8,28,28], index: 1, kind: output, shape index: {}]  }
   0x1   :  { %8 = vsyncpa [#allocation3 + $0x1], 0  ;;  %s383_s6 = smov 0   ;;  %s385_s7 = smov 0  }
   0x2   :  { %s387_s8 = smov 0   ;;  %s389_s9 = smov 0  }
   0x3 LB: > { %s245_s10 = sadd.s32 4294967295, %s368_s9   ;;  %s403_s11 = sadd.s32 1, %s368_s9   ;;  %s368_s9 = sphi %s389_s9, %s550_s9   ;;  %s364_s8 = sphi %s387_s8, %s549_s8   ;;  %s360_s7 = sphi %s385_s7, %s548_s7   ;;  %s356_s6 = sphi %s383_s6, %s547_s6  }
   0x4   : > { %s18_s12 = ssub.s32 %s368_s9, %s403_s11  ;;  %s21_s13 = sadd.s32 1, %s364_s8 }
   0x5   : > { %p19_p0 = scmp.eq.s32.totalorder %s18_s12, 0  ;;  %p28_p1 = scmp.ne.s32.totalorder %s364_s8, %s360_s7 }
   0x6   : > { %p29_p2 = scmp.eq.s32.totalorder %s368_s9, 0  ;;  %p34_p3 = scmp.ne.s32.totalorder %s360_s7, %s356_s6 }
   0x7   : > { %s413_s14 = scalar_select %p19_p0, %s364_s8, %s21_s13  }
   0x8   : > { %p30_p4 = por %p29_p2, %p28_p1  ;;  %p35_p5 = scmp.eq.s32.totalorder %s245_s10, 0 }
   0x9   : > { %p269_p6 = scmp.lt.s32.totalorder %s368_s9, 2  ;;  %s84_s16 = sand.u32 1, %s364_s8  }
   0xa   : > { %p418_p7 = por %p35_p5, %p34_p3  ;;  %s249_s17 = sshll.u32 %s84_s16, 7 }
   0xb   : > { %s261_s18 = sshll.u32 %s368_s9, 11  ;;  %s88_s22 = scalar_lea.vmem [#allocation2], %s249_s17 }
   0xc   : > { %s427_s21 = scalar_lea.hbm %s542_s0, %s261_s18  ;;  %s96_s23 = sshll.u32 %s88_s22, 4  ;;  %s429_s23 = int_to_ptr.vmem [resolvable:$true] %s96_s23 }
   0xd   : > { %p431_p8 = pnand %p269_p6, %p30_p4  ;;  %s436_s25 = scalar_lea.sflag [#allocation3], %s84_s16 }
   0xe   : > { %s304_s26 = scalar_lea.hbm %s427_s21, 2048  ;;  %s309_s29 = scalar_lea.hbm %s542_s0, 4096 }
   0xf   : > { %p305_p10 = scmp.ne.s32.totalorder %s427_s21, %s304_s26  ;;  %p306_p11 = pneg %p431_p8 }
  0x10   : > { %p310_p0 = scmp.lt.u32.totalorder %s427_s21, %s542_s0  ;;  %p311_p1 = scmp.lt.u32.totalorder %s309_s29, %s304_s26 }
  0x11   : > { %p307_p12 = pnand %p306_p11, %p305_p10  ;;  %p313_p3 = scmp.lt.u32.totalorder %s304_s26, %s427_s21 }
  0x12   : > { %p312_p2 = por %p311_p1, %p310_p0 }
  0x13   : > { %p308_p13 = pneg %p307_p12 }
  0x14   : > { %p314_p4 = por %p313_p3, %p312_p2 }
  0x16   : > { %p315_p5 = pnand %p314_p4, %p308_p13 }
  0x18   : > { %318 = shalt.err (!%p315_p5)
}
  0x19   : > { %s319_s3 = scalar_lea.vmem %s429_s23, 2048  ;;  %s370_s4 = smov [#allocation2]  }
  0x1a   : > { %p320_p6 = scmp.ne.s32.totalorder %s429_s23, %s319_s3  ;;  %s324_s5 = sshll.u32 %s370_s4, 4  ;;  %s325_s5 = int_to_ptr.vmem [resolvable:$false] %s324_s5 }
  0x1b   : > { %s326_s6 = scalar_lea.vmem %s325_s5, 4096  ;;  %p327_p9 = scmp.lt.s32.totalorder %s429_s23, %s325_s5 }
  0x1c   : > { %p322_p10 = pnand %p320_p6, %p306_p11  ;;  %p328_p0 = scmp.lt.s32.totalorder %s326_s6, %s319_s3 }
  0x1e   : > { %p323_p12 = pneg %p322_p10  ;;  %p329_p1 = por %p328_p0, %p327_p9 }
  0x20   : > { %p330_p2 = pnand %p329_p1, %p323_p12 }
  0x22   : > { %333 = shalt.err (!%p330_p2)
}
  0x23   : > { %s371_s12 = smov 128   ;;  %s372_s13 = smov 8  }
  0x24   : > { %268 = dma.hbm_to_vmem [thread:$0]  (!%p431_p8), %s427_s21, 2048, %s429_s23, %s436_s25, %s371_s12, %s371_s12, %s372_s13  }
  0x25   : > { %p104_p11 = scmp.lt.s32.totalorder %s368_s9, 3  ;;  %p546_p13 = scmp.ge.s32.totalorder %s368_s9, 1 }
  0x27   : > { %p105_p3 = pnand %p546_p13, %p104_p11 }
  0x28   : > { %s110_s16 = sand.u32 (!%p105_p3), 1, %s360_s7  }
  0x29   : > { %108 = sbr.rel (%p105_p3) target bundleno = 63 (0x3f), region = 24  ;;  %s254_s17 = sshll.u32 (!%p105_p3), %s110_s16, 7 }
  0x2a   : > { %s111_s18 = scalar_lea.sflag (!%p105_p3), [#allocation3], %s110_s16  ;;  %s468_s19 = scalar_lea.vmem (!%p105_p3), [#allocation2], %s254_s17 }
  0x30   : > { %351 = dma.done.wait (%p418_p7), %s111_s18, 2048  }
  0x31   : > { %353 = vsyncadd (%p418_p7), %s111_s18, 4294965248  ;;  %s255_s20 = sshll.u32 %s245_s10, 2  ;;  %vm158_vm0 = vcmask 228352   ;;  %vm162_vm1 = vcmask 224256   ;;  %v142_v0 = vld [vmem:[%s468_s19] sm:$0xff]  ;;  %v143_v1 = vld [vmem:[%s468_s19 + $0x8] sm:$0xff] }
  0x32   : > { %p136_p8 = scmp.lt.s32.totalorder %s255_s20, 7  ;;  %v144_v2 = vld [vmem:[%s468_s19 + $0x10] sm:$0xff]  ;;  %v145_v3 = vld [vmem:[%s468_s19 + $0x18] sm:$0xf]  ;;  %v146_v4 = vld [vmem:[%s468_s19 + $0x20] sm:$0xff] }
  0x33   : > { %v147_v5 = vld [vmem:[%s468_s19 + $0x28] sm:$0xff]  ;;  %v148_v6 = vld [vmem:[%s468_s19 + $0x30] sm:$0xff]  ;;  %v149_v7 = vld [vmem:[%s468_s19 + $0x38] sm:$0xf] }
  0x34   : > { %s552_s20 = smov (!%p136_p8, %s255_s20), 7  ;;  %v150_v8 = vld [vmem:[%s468_s19 + $0x40] sm:$0xff]  ;;  %v151_v9 = vld [vmem:[%s468_s19 + $0x48] sm:$0xff]  ;;  %v152_v10 = vld [vmem:[%s468_s19 + $0x50] sm:$0xff] }
  0x35   : > { %s262_s21 = sshll.u32 %s552_s20, 5  ;;  %v153_v11 = vld [vmem:[%s468_s19 + $0x58] sm:$0xf]  ;;  %v154_v12 = vld [vmem:[%s468_s19 + $0x60] sm:$0xff]  ;;  %v155_v13 = vld [vmem:[%s468_s19 + $0x68] sm:$0xff] }
  0x36   : > { %s479_s15 = scalar_lea.vmem %s543_s1, %s262_s21  ;;  %v156_v14 = vld [vmem:[%s468_s19 + $0x70] sm:$0xff]  ;;  %v157_v15 = vld [vmem:[%s468_s19 + $0x78] sm:$0xf] }
  0x37   : > { %159 = vst.msk [vmem:[%s479_s15] sm:$0xff] %vm158_vm0, %v142_v0  ;;  %160 = vst.msk [vmem:[%s479_s15 + $0x8] sm:$0xff] %vm158_vm0, %v143_v1 }
  0x38   : > { %161 = vst.msk [vmem:[%s479_s15 + $0x10] sm:$0xff] %vm158_vm0, %v144_v2  ;;  %164 = vst.msk [vmem:[%s479_s15 + $0x20] sm:$0xff] %vm158_vm0, %v146_v4 }
  0x39   : > { %163 = vst.msk [vmem:[%s479_s15 + $0x18] sm:$0xf] %vm162_vm1, %v145_v3  ;;  %167 = vst.msk [vmem:[%s479_s15 + $0x38] sm:$0xf] %vm162_vm1, %v149_v7 }
  0x3a   : > { %165 = vst.msk [vmem:[%s479_s15 + $0x28] sm:$0xff] %vm158_vm0, %v147_v5  ;;  %166 = vst.msk [vmem:[%s479_s15 + $0x30] sm:$0xff] %vm158_vm0, %v148_v6 }
  0x3b   : > { %168 = vst.msk [vmem:[%s479_s15 + $0x40] sm:$0xff] %vm158_vm0, %v150_v8  ;;  %169 = vst.msk [vmem:[%s479_s15 + $0x48] sm:$0xff] %vm158_vm0, %v151_v9 }
  0x3c   : > { %170 = vst.msk [vmem:[%s479_s15 + $0x50] sm:$0xff] %vm158_vm0, %v152_v10  ;;  %172 = vst.msk [vmem:[%s479_s15 + $0x60] sm:$0xff] %vm158_vm0, %v154_v12 }
  0x3d   : > { %171 = vst.msk [vmem:[%s479_s15 + $0x58] sm:$0xf] %vm162_vm1, %v153_v11  ;;  %175 = vst.msk [vmem:[%s479_s15 + $0x78] sm:$0xf] %vm162_vm1, %v157_v15 }
  0x3e   : > { %173 = vst.msk [vmem:[%s479_s15 + $0x68] sm:$0xff] %vm158_vm0, %v155_v13  ;;  %174 = vst.msk [vmem:[%s479_s15 + $0x70] sm:$0xff] %vm158_vm0, %v156_v14 }
  0x3f PF: > { %p11_p7 = scmp.ge.s32.totalorder %s403_s11, 4   ;;  %s547_s6 = smov %s360_s7 }
  0x40   : > { %s548_s7 = smov %s364_s8  ;;  %s549_s8 = smov %s413_s14 }
  0x41   : > { %s550_s9 = smov %s403_s11  ;;  %13 = sbr.rel (!%p11_p7) target bundleno = 3 (0x3), region = 64 }
  0x48   :  { %200 = vsyncpa [#allocation3], 1 }
  0x49   :  { %202 = vsyncpa [#allocation3 + $0x1], 1 }

</bundles_post_ra>
